<compile_context>
chip_gen: v6e
topology: v6e:2x2x1
jax: 0.10.0
libtpu: 0.0.40
codegen_flags: <defaults>
</compile_context>

<pallas_src>
import jax
import jax.numpy as jnp
from jax.experimental import pallas as pl
from jax.experimental.pallas import tpu as pltpu

LANE = 128      # vreg lane width
SUBLANE = 8     # vreg sublane count
MAX_BLOCK_B = 2048  # large lane-dense tile; tiny VMEM footprint even double-buffered


def mlp_kernel(x_ref, w1_ref, b1_ref, w2_ref, b2_ref, o_ref):
    # Lane-major layout: batch on lanes (last axis), hidden on sublanes.
    #   x_ref : (1, block_B)       input scalar per sample
    #   w1_ref: (hidden_pad, 1)    fc1 weight column (in=1), zero-padded to 8 rows
    #   b1_ref: (hidden_pad, 1)    fc1 bias, zero-padded
    #   w2_ref: (hidden_pad, 1)    fc2 weight row as a column, zero-padded
    #   b2_ref: (1, 1)             fc2 bias
    #   o_ref : (1, block_B)       output scalar per sample (lane-dense store)
    x = x_ref[...]                                            # (1, block_B)
    # fc1 + ReLU: pure VPU broadcast multiply-add (no MXU push/pop).
    h = jnp.maximum(w1_ref[...] * x + b1_ref[...], 0.0)       # (hidden_pad, block_B)
    # fc2: elementwise multiply + sublane reduction (XLU) + bias broadcast.
    y = jnp.sum(w2_ref[...] * h, axis=0, keepdims=True) + b2_ref[...]
    o_ref[...] = y.astype(o_ref.dtype)                        # unmasked lane-dense vst


def layer_network_forward(x, w1, b1, w2, b2):
    """x: (B, 1) f32; w1: (1, hidden); b1: (1, hidden); w2: (hidden, 1); b2: (1, 1).
    Returns (B, 1) f32 — identical semantics to fc2(relu(fc1(x)))."""
    B = x.shape[0]
    hidden = w1.shape[1]
    hidden_pad = max(SUBLANE, pl.cdiv(hidden, SUBLANE) * SUBLANE)

    # --- lane-major re-layout: batch -> lanes, padded to the tile size -------
    block_B = min(max(LANE, pl.cdiv(B, LANE) * LANE), MAX_BLOCK_B)
    B_pad = pl.cdiv(B, block_B) * block_B
    x_t = jnp.zeros((1, B_pad), jnp.float32).at[0, :B].set(x[:, 0])

    # Zero-padded hidden rows contribute 0 through ReLU and the fc2 reduction.
    w1c = jnp.zeros((hidden_pad, 1), jnp.float32).at[:hidden, 0].set(w1[0, :])
    b1c = jnp.zeros((hidden_pad, 1), jnp.float32).at[:hidden, 0].set(b1[0, :])
    w2c = jnp.zeros((hidden_pad, 1), jnp.float32).at[:hidden, 0].set(w2[:, 0])
    b2c = b2.reshape(1, 1).astype(jnp.float32)

    grid = (B_pad // block_B,)
    out_t = pl.pallas_call(
        mlp_kernel,
        out_shape=jax.ShapeDtypeStruct((1, B_pad), jnp.float32),
        grid=grid,
        in_specs=[
            pl.BlockSpec((1, block_B), lambda i: (0, i)),      # x: tiled over batch lanes
            pl.BlockSpec((hidden_pad, 1), lambda i: (0, 0)),   # weights: VMEM-resident
            pl.BlockSpec((hidden_pad, 1), lambda i: (0, 0)),
            pl.BlockSpec((hidden_pad, 1), lambda i: (0, 0)),
            pl.BlockSpec((1, 1), lambda i: (0, 0)),
        ],
        out_specs=pl.BlockSpec((1, block_B), lambda i: (0, i)),
        compiler_params=pltpu.CompilerParams(
            dimension_semantics=("parallel",)),                # v7x: split grid over 2 TCs
    )(x_t, w1c, b1c, w2c, b2c)

    return out_t[0, :B].reshape(B, 1)


def init_params(key, input_size, hidden_size, output_size):
    """Deterministic init mimicking nn.Linear's U(-1/sqrt(fan_in), 1/sqrt(fan_in)).
    Weights stored pre-transposed: w1 is [in, hidden], w2 is [hidden, out]."""
    k1, k2, k3, k4 = jax.random.split(key, 4)
    bound1 = 1.0 / (input_size ** 0.5)
    bound2 = 1.0 / (hidden_size ** 0.5)
    w1 = jax.random.uniform(k1, (input_size, hidden_size), jnp.float32, -bound1, bound1)
    b1 = jax.random.uniform(k2, (1, hidden_size), jnp.float32, -bound1, bound1)
    w2 = jax.random.uniform(k3, (hidden_size, output_size), jnp.float32, -bound2, bound2)
    b2 = jax.random.uniform(k4, (1, output_size), jnp.float32, -bound2, bound2)
    return w1, b1, w2, b2


if __name__ == "__main__":
    input_size, hidden_size, output_size = 1, 5, 1
    batch = 8

    key = jax.random.PRNGKey(0)
    kx, kp = jax.random.split(key)
    x = jax.random.normal(kx, (batch, input_size), jnp.float32)
    w1, b1, w2, b2 = init_params(kp, input_size, hidden_size, output_size)

    out = jax.block_until_ready(layer_network_forward(x, w1, b1, w2, b2))

    # Pure-JAX reference check of the forward semantics.
    ref = jnp.maximum(x @ w1 + b1, 0.0) @ w2 + b2
    assert out.shape == (batch, output_size)
    assert jnp.allclose(out, ref, atol=1e-5), "mismatch vs reference"

    print("KERNEL_OK")
</pallas_src>

<mosaic_0001>
module attributes {stable_mosaic.version = 11 : i64} {
  func.func @mlp_kernel(%arg0: i32, %arg1: memref<1x128xf32, #tpu.memory_space<vmem>>, %arg2: memref<8x1xf32, #tpu.memory_space<vmem>>, %arg3: memref<8x1xf32, #tpu.memory_space<vmem>>, %arg4: memref<8x1xf32, #tpu.memory_space<vmem>>, %arg5: memref<1x1xf32, #tpu.memory_space<vmem>>, %arg6: memref<1x128xf32, #tpu.memory_space<vmem>>) attributes {dimension_semantics = [#tpu.dimension_semantics<parallel>], iteration_bounds = array<i64: 1>, scalar_prefetch = 0 : i64, scratch_operands = 0 : i64, tpu.core_type = #tpu.core_type<tc>, window_params = [{transform_indices = @transform_0, window_bounds = array<i64: 1, 128>}, {pipeline_mode = #tpu.pipeline_mode<synchronous>, transform_indices = @transform_1, window_bounds = array<i64: 8, 1>}, {pipeline_mode = #tpu.pipeline_mode<synchronous>, transform_indices = @transform_2, window_bounds = array<i64: 8, 1>}, {pipeline_mode = #tpu.pipeline_mode<synchronous>, transform_indices = @transform_3, window_bounds = array<i64: 8, 1>}, {pipeline_mode = #tpu.pipeline_mode<synchronous>, transform_indices = @transform_4, window_bounds = array<i64: 1, 1>}, {transform_indices = @transform_5, window_bounds = array<i64: 1, 128>}]} {
    %c0 = arith.constant 0 : index
    %c0_0 = arith.constant 0 : index
    %0 = vector.load %arg1[%c0, %c0_0] : memref<1x128xf32, #tpu.memory_space<vmem>>, vector<1x128xf32>
    %c0_1 = arith.constant 0 : index
    %c0_2 = arith.constant 0 : index
    %1 = vector.load %arg2[%c0_1, %c0_2] : memref<8x1xf32, #tpu.memory_space<vmem>>, vector<8x1xf32>
    %2 = vector.broadcast %1 : vector<8x1xf32> to vector<8x128xf32>
    %3 = vector.broadcast %0 : vector<1x128xf32> to vector<8x128xf32>
    %4 = arith.mulf %2, %3 : vector<8x128xf32>
    %c0_3 = arith.constant 0 : index
    %c0_4 = arith.constant 0 : index
    %5 = vector.load %arg3[%c0_3, %c0_4] : memref<8x1xf32, #tpu.memory_space<vmem>>, vector<8x1xf32>
    %6 = vector.broadcast %5 : vector<8x1xf32> to vector<8x128xf32>
    %7 = arith.addf %4, %6 : vector<8x128xf32>
    %cst = arith.constant 0.000000e+00 : f32
    %8 = vector.broadcast %cst : f32 to vector<8x128xf32>
    %9 = arith.maximumf %7, %8 : vector<8x128xf32>
    %c0_5 = arith.constant 0 : index
    %c0_6 = arith.constant 0 : index
    %10 = vector.load %arg4[%c0_5, %c0_6] : memref<8x1xf32, #tpu.memory_space<vmem>>, vector<8x1xf32>
    %11 = vector.broadcast %10 : vector<8x1xf32> to vector<8x128xf32>
    %12 = arith.mulf %11, %9 : vector<8x128xf32>
    %cst_7 = arith.constant dense<0.000000e+00> : vector<128xf32>
    %13 = vector.multi_reduction <add>, %12, %cst_7 [0] : vector<8x128xf32> to vector<128xf32>
    %14 = vector.shape_cast %13 : vector<128xf32> to vector<1x128xf32>
    %c0_8 = arith.constant 0 : index
    %c0_9 = arith.constant 0 : index
    %15 = vector.load %arg5[%c0_8, %c0_9] : memref<1x1xf32, #tpu.memory_space<vmem>>, vector<1x1xf32>
    %16 = vector.broadcast %15 : vector<1x1xf32> to vector<1x128xf32>
    %17 = arith.addf %14, %16 : vector<1x128xf32>
    %c0_10 = arith.constant 0 : index
    %c0_11 = arith.constant 0 : index
    %18 = vector.load %arg6[%c0_10, %c0_11] : memref<1x128xf32, #tpu.memory_space<vmem>>, vector<1x128xf32>
    tpu.vector_store %arg6[%c0_10, %c0_11], %17 {strides = array<i32>} : memref<1x128xf32, #tpu.memory_space<vmem>>, vector<1x128xf32>,
    return
  }
  func.func @transform_0(%arg0: i32) -> (i32, i32) {
    %c0_i32 = arith.constant 0 : i32
    %c0_i32_0 = arith.constant 0 : i32
    return %c0_i32, %arg0 : i32, i32
  }
  func.func @transform_1(%arg0: i32) -> (i32, i32) {
    %c0_i32 = arith.constant 0 : i32
    %c0_i32_0 = arith.constant 0 : i32
    %c0_i32_1 = arith.constant 0 : i32
    return %c0_i32, %c0_i32_0 : i32, i32
  }
  func.func @transform_2(%arg0: i32) -> (i32, i32) {
    %c0_i32 = arith.constant 0 : i32
    %c0_i32_0 = arith.constant 0 : i32
    %c0_i32_1 = arith.constant 0 : i32
    return %c0_i32, %c0_i32_0 : i32, i32
  }
  func.func @transform_3(%arg0: i32) -> (i32, i32) {
    %c0_i32 = arith.constant 0 : i32
    %c0_i32_0 = arith.constant 0 : i32
    %c0_i32_1 = arith.constant 0 : i32
    return %c0_i32, %c0_i32_0 : i32, i32
  }
  func.func @transform_4(%arg0: i32) -> (i32, i32) {
    %c0_i32 = arith.constant 0 : i32
    %c0_i32_0 = arith.constant 0 : i32
    %c0_i32_1 = arith.constant 0 : i32
    return %c0_i32, %c0_i32_0 : i32, i32
  }
  func.func @transform_5(%arg0: i32) -> (i32, i32) {
    %c0_i32 = arith.constant 0 : i32
    %c0_i32_0 = arith.constant 0 : i32
    return %c0_i32, %arg0 : i32, i32
  }
}

</mosaic_0001>

<bundles_post_ra>
// kernel: tpu_custom_call.1
= control target key start
LH: loop header
LB: loop body
LE: loop exit
PB: predicated region body
PF: predicated region fallthrough
CT: control target
= control target key end

     0   :  { %s161_s0 = inlined_call_operand.vmem [shape: f32[1,128], index: 0, kind: input, shape index: {}]   ;;  %s162_s1 = inlined_call_operand.vmem [shape: f32[8,1], index: 1, kind: input, shape index: {}]   ;;  %s163_s2 = inlined_call_operand.vmem [shape: f32[8,1], index: 2, kind: input, shape index: {}]   ;;  %s164_s3 = inlined_call_operand.vmem [shape: f32[8,1], index: 3, kind: input, shape index: {}]   ;;  %s165_s4 = inlined_call_operand.<no memory space> [shape: f32[1,1], index: 4, kind: input, shape index: {}]   ;;  %s166_s5 = inlined_call_operand.hbm [shape: f32[1,128], index: 5, kind: output, shape index: {}]  }
   0x1   :  { %v10_v0 = vstv %s165_s4 }
   0x2   :  { %11 = vst [vmem:[#allocation2] sm:$0x1] %v10_v0 }
   0x3   :  { %v24_v1 = vld [vmem:[%s162_s1] sm:$0xff]  ;;  %v111_v3 = vmov 0  }
   0x4   :  { %v45_v2 = vld [vmem:[%s164_s3] sm:$0xff]  ;;  %87 = vset.pattern.permute.xlu0 %v111_v3  ;;  %88 = vset.pattern.permute.xlu1 %v111_v3 }
   0x5   :  { %12 = vsyncpa [#allocation4], 0  ;;  %27 = vperm.xlu0 %87, %v24_v1   ;;  %48 = vperm.xlu1 %88, %v45_v2   ;;  %v37_v4 = vld [vmem:[%s163_s2] sm:$0xff]  ;;  %v64_v14 = vlaneseq  ;;  %s112_s2 = smov [#allocation3]  }
   0x6   :  { %v84_v7 = vld [vmem:[%s161_s0] ss:$0 sm:$0xff]  ;;  %s76_s3 = sshll.u32 %s112_s2, 4  ;;  %s77_s3 = int_to_ptr.vmem [resolvable:$true] %s76_s3 }
   0x7   :  { %v65_v17 = vshrl.u32 %v64_v14, 7  ;;  %s89_s0 = scalar_lea.vmem %s77_s3, 16  ;;  %s93_s26 = scalar_lea.vmem %s77_s3, 32 }
   0x8   :  { %p90_p0 = scmp.ne.s32.totalorder %s77_s3, %s89_s0  ;;  %p94_p1 = scmp.lt.s32.totalorder %s77_s3, %s77_s3 }
   0x9   :  { %v58_v5 = vld [vmem:[#allocation2] sm:$0x1]  ;;  %40 = vperm.xlu0 %87, %v37_v4   ;;  %v66_v19 = vsub.s32 0, %v65_v17  ;;  %p95_p2 = scmp.lt.s32.totalorder %s93_s26, %s89_s0 }
   0xa   :  { %61 = vperm.xlu1 %88, %v58_v5  }
   0xb   :  { %p96_p3 = por %p95_p2, %p94_p1 }
   0xd   :  { %p97_p4 = pnand %p96_p3, %p90_p0 }
  0x80   :  { %v28_v6 = vpop.permute.xlu0 %27  ;;  %v49_v12 = vpop.permute.xlu1 %48 }
  0x81   :  { %v36_v8 = vmul.f32 %v84_v7, %v28_v6 }
  0x84   :  { %v41_v9 = vpop.permute.xlu0 %40 }
  0x85   :  { %v43_v10 = vadd.f32 %v41_v9, %v36_v8  ;;  %v62_v21 = vpop.permute.xlu1 %61 }
  0x86   :  { %v67_v23 = vrot.slane %v62_v21, %v66_v19 }
  0x87   :  { %v44_v11 = vmax.f32 %v43_v10, 0.0 }
  0x89   :  { %v51_v13 = vmul.f32 %v49_v12, %v44_v11 }
  0x8b   :  { %v52_v15 = vrot.slane %v51_v13, 4 }
  0x8d   :  { %v53_v16 = vadd.f32 %v52_v15, %v51_v13 }
  0x8f   :  { %v54_v18 = vrot.slane %v53_v16, 2 }
  0x91   :  { %v55_v20 = vadd.f32 %v54_v18, %v53_v16 }
  0x93   :  { %v56_v22 = vrot.slane %v55_v20, 1 }
  0x95   :  { %v57_v24 = vadd.f32 %v56_v22, %v55_v20 }
  0x97   :  { %v68_v25 = vadd.f32 %v67_v23, %v57_v24 }
  0x99   :  { %69 = vst [vmem:[#allocation3] sm:$0x1] %v68_v25 }
  0x9a   :  { %100 = shalt.err (!%p97_p4)
}
  0x9b   :  { %79 = dma.vmem_to_hbm [thread:$0]  %s77_s3, 16, %s166_s5, [#allocation4]  }
  0x9c   :  { %109 = dma.done.wait [#allocation4], 16  }
  0x9d   :  { %110 = vsyncadd [#allocation4], 4294967280 }
  0x9e   :  { %83 = vsyncpa [#allocation4], 1 }

</bundles_post_ra>
